<compile_context>
chip_gen: v5e
topology: v5e:2x2
jax: 0.10.0
libtpu: 0.0.40
codegen_flags: <defaults>
</compile_context>

<pallas_src>
import jax
import jax.numpy as jnp
from jax.experimental import pallas as pl
from jax.experimental.pallas import tpu as pltpu

LANE = 128
SUBLANE = 8
OUT_PAD = LANE  # final Linear(H, 1) padded to a lane-dense 128-col output


def _round_up(x, m):
    return (x + m - 1) // m * m


def _make_classifier_kernel(num_layers: int):
    """kernel refs = (cls, W0, b0, ..., W_last, b_last, out)."""
    n_linears = num_layers + 1

    def kernel(*refs):
        cls_ref = refs[0]
        param_refs = refs[1:1 + 2 * n_linears]
        out_ref = refs[-1]

        # (tm, E_pad) bf16 activation tile.
        x = cls_ref[...]

        # Hidden layers: bf16 matmul, f32 accumulate, f32 bias+ReLU.
        for i in range(num_layers):
            w = param_refs[2 * i][...]            # bf16 (in_pad, H_pad)
            b = param_refs[2 * i + 1][...]        # f32  (1, H_pad)
            y = jnp.dot(x, w, preferred_element_type=jnp.float32) + b
            y = jnp.maximum(y, 0.0)               # f32 VPU work
            x = y.astype(jnp.bfloat16)            # next MXU operand

        # Final Linear(H, 1), lane-padded to 128 output columns.
        w = param_refs[-2][...]                   # bf16 (H_pad, 128)
        b = param_refs[-1][...]                   # f32  (1, 128)
        out_ref[...] = jnp.dot(x, w, preferred_element_type=jnp.float32) + b

    return kernel


def prepare_esm_classifier(embed_table, params):
    """One-time padding / casting of the ESM stand-in table and classifier
    params.  Call once at init; reuse the returned pytree on every forward so
    no per-call weight re-padding / re-casting traffic hits HBM."""
    V, E = embed_table.shape
    num_layers = len(params) - 1
    H = params[0][0].shape[1]
    E_pad = _round_up(E, LANE)
    H_pad = _round_up(H, LANE)

    # bf16, lane-padded table: the CLS gather then yields lane-aligned bf16
    # rows directly (half the gather bytes of an f32 gather).
    emb_bf16 = jnp.pad(embed_table.astype(jnp.bfloat16),
                       ((0, 0), (0, E_pad - E)))

    # Padded/cast classifier params (weights bf16, biases f32).  Padding MUST
    # be zero so padded lanes stay zero through ReLU.
    flat_params = []
    in_dim, in_pad = E, E_pad
    for li in range(num_layers):
        w, b = params[li]
        out_dim = w.shape[1]
        wp = jnp.pad(w.astype(jnp.bfloat16),
                     ((0, in_pad - in_dim), (0, H_pad - out_dim)))
        bp = jnp.pad(b.astype(jnp.float32), ((0, 0), (0, H_pad - out_dim)))
        flat_params += [wp, bp]
        in_dim, in_pad = out_dim, H_pad
    w, b = params[-1]
    wp = jnp.pad(w.astype(jnp.bfloat16),
                 ((0, in_pad - in_dim), (0, OUT_PAD - 1)))
    bp = jnp.pad(b.astype(jnp.float32), ((0, 0), (0, OUT_PAD - 1)))
    flat_params += [wp, bp]

    return {
        "embed_bf16": emb_bf16,
        "flat_params": tuple(flat_params),
        "num_layers": num_layers,
        "E_pad": E_pad,
        "H_pad": H_pad,
    }


def esm_classifier_forward(tokens, prepared, *, tm=None):
    """ESMClassifier forward.

    tokens:   (B, L) int32
    prepared: output of prepare_esm_classifier()
    returns:  (B,) float32 logits
    """
    emb = prepared["embed_bf16"]
    flat_params = prepared["flat_params"]
    num_layers = prepared["num_layers"]
    E_pad = prepared["E_pad"]
    H_pad = prepared["H_pad"]

    B = tokens.shape[0]

    # --- plain-JAX glue: ESM stand-in, CLS token only -----------------------
    # TODO(synk): real ESM transformer not re-implemented; bf16 CLS-row lookup
    # stands in for results['representations'][6][:, 0, :].
    cls = emb[tokens[:, 0]]                       # (B, E_pad) bf16, no [B,L,E]

    # --- batch tiling --------------------------------------------------------
    if tm is None:
        if B > SUBLANE:
            # >=2 grid steps so the "parallel" batch axis can shard across the
            # 2nd TensorCore on v7x.  On single-TC parts (v5e/v6e) pass tm=256
            # explicitly for fewer per-step overheads.
            tm = min(128, _round_up(pl.cdiv(B, 2), SUBLANE))
        else:
            tm = _round_up(B, SUBLANE)
    B_pad = _round_up(max(B, tm), tm)
    cls_p = jnp.pad(cls, ((0, B_pad - B), (0, 0)))  # single pad, bf16

    kernel = _make_classifier_kernel(num_layers)

    # Activations stream (double-buffered by default); weights/biases are
    # resident (constant index_map) and single-buffered to halve their VMEM.
    resident = pl.Buffered(1)
    in_specs = [pl.BlockSpec((tm, E_pad), lambda i: (i, 0))]
    for p in flat_params:
        in_specs.append(
            pl.BlockSpec(p.shape, lambda i: (0, 0), pipeline_mode=resident))

    weight_bytes = sum(int(p.size) * p.dtype.itemsize for p in flat_params)
    act_in_bytes = B_pad * E_pad * 2
    out_bytes = B_pad * OUT_PAD * 4
    flops = 2 * B_pad * (E_pad * H_pad
                         + max(num_layers - 1, 0) * H_pad * H_pad
                         + H_pad * OUT_PAD)
    cost = pl.CostEstimate(
        flops=int(flops),
        transcendentals=0,
        bytes_accessed=int(weight_bytes + act_in_bytes + out_bytes))

    # Scoped VMEM: single-buffered weights + double-buffered activation /
    # output tiles + f32 intermediates, with headroom.  Matters on v5e where
    # the default scoped limit is small relative to real ESM weight sizes.
    vmem_needed = (weight_bytes
                   + 2 * tm * E_pad * 2            # in tile, double-buffered
                   + 2 * tm * OUT_PAD * 4          # out tile, double-buffered
                   + 2 * tm * H_pad * 4)           # f32 intermediates
    vmem_limit = int(min(100 * 1024 * 1024,
                         max(32 * 1024 * 1024, 2 * vmem_needed + (8 << 20))))

    out = pl.pallas_call(
        kernel,
        out_shape=jax.ShapeDtypeStruct((B_pad, OUT_PAD), jnp.float32),
        grid=(B_pad // tm,),
        in_specs=in_specs,
        out_specs=pl.BlockSpec((tm, OUT_PAD), lambda i: (i, 0)),
        compiler_params=pltpu.CompilerParams(
            dimension_semantics=("parallel",),     # shard batch across TCs
            vmem_limit_bytes=vmem_limit),
        cost_estimate=cost,
    )(cls_p, *flat_params)

    # logits.view(-1): real rows, real (single) output column.
    return out[:B, 0]


def _init_params(key, embed_dim, hidden_dim, num_layers):
    """Deterministic init matching nn.Linear shapes (stored transposed)."""
    params = []
    in_dim = embed_dim
    for _ in range(num_layers):
        key, kw, kb = jax.random.split(key, 3)
        bound = 1.0 / jnp.sqrt(in_dim)
        w = jax.random.uniform(kw, (in_dim, hidden_dim), jnp.float32, -bound, bound)
        b = jax.random.uniform(kb, (1, hidden_dim), jnp.float32, -bound, bound)
        params.append((w, b))
        in_dim = hidden_dim
    key, kw, kb = jax.random.split(key, 3)
    bound = 1.0 / jnp.sqrt(in_dim)
    w = jax.random.uniform(kw, (in_dim, 1), jnp.float32, -bound, bound)
    b = jax.random.uniform(kb, (1, 1), jnp.float32, -bound, bound)
    params.append((w, b))
    return params, key


def _ref_forward(tokens, embed_table, params):
    """Pure-JAX reference with matching bf16 operand quantization."""
    def q(a):
        return a.astype(jnp.bfloat16).astype(jnp.float32)

    x = q(embed_table[tokens[:, 0]])
    for w, b in params[:-1]:
        x = q(jnp.maximum(x @ q(w) + b, 0.0))
    w, b = params[-1]
    return (x @ q(w) + b).reshape(-1)


if __name__ == "__main__":
    # Small shapes: batch=2, seq_len=8, vocab=33, embed_dim=32, hidden=32, layers=2
    B, L, V, E, H, NL = 2, 8, 33, 32, 32, 2

    key = jax.random.PRNGKey(0)
    key, k_tok, k_emb = jax.random.split(key, 3)

    tokens = jax.random.randint(k_tok, (B, L), 0, V, dtype=jnp.int32)
    embed_table = jax.random.normal(k_emb, (V, E), dtype=jnp.float32)
    params, key = _init_params(key, E, H, NL)

    prepared = prepare_esm_classifier(embed_table, params)  # once at init
    logits = esm_classifier_forward(tokens, prepared)
    jax.block_until_ready(logits)

    ref = _ref_forward(tokens, embed_table, params)
    assert logits.shape == (B,)
    assert jnp.allclose(logits, ref, atol=2e-3, rtol=2e-3), "mismatch vs reference"

    print("KERNEL_OK")
</pallas_src>

<mosaic_0001>
module attributes {stable_mosaic.version = 11 : i64} {
  func.func @kernel(%arg0: i32, %arg1: memref<8x128xbf16, #tpu.memory_space<vmem>>, %arg2: memref<128x128xbf16, #tpu.memory_space<vmem>>, %arg3: memref<1x128xf32, #tpu.memory_space<vmem>>, %arg4: memref<128x128xbf16, #tpu.memory_space<vmem>>, %arg5: memref<1x128xf32, #tpu.memory_space<vmem>>, %arg6: memref<128x128xbf16, #tpu.memory_space<vmem>>, %arg7: memref<1x128xf32, #tpu.memory_space<vmem>>, %arg8: memref<8x128xf32, #tpu.memory_space<vmem>>) attributes {dimension_semantics = [#tpu.dimension_semantics<parallel>], iteration_bounds = array<i64: 1>, scalar_prefetch = 0 : i64, scratch_operands = 0 : i64, tpu.core_type = #tpu.core_type<tc>, window_params = [{transform_indices = @transform_0, window_bounds = array<i64: 8, 128>}, {pipeline_mode = #tpu.pipeline_mode<synchronous>, transform_indices = @transform_1, window_bounds = array<i64: 128, 128>}, {pipeline_mode = #tpu.pipeline_mode<synchronous>, transform_indices = @transform_2, window_bounds = array<i64: 1, 128>}, {pipeline_mode = #tpu.pipeline_mode<synchronous>, transform_indices = @transform_3, window_bounds = array<i64: 128, 128>}, {pipeline_mode = #tpu.pipeline_mode<synchronous>, transform_indices = @transform_4, window_bounds = array<i64: 1, 128>}, {pipeline_mode = #tpu.pipeline_mode<synchronous>, transform_indices = @transform_5, window_bounds = array<i64: 128, 128>}, {pipeline_mode = #tpu.pipeline_mode<synchronous>, transform_indices = @transform_6, window_bounds = array<i64: 1, 128>}, {transform_indices = @transform_7, window_bounds = array<i64: 8, 128>}]} {
    %c0 = arith.constant 0 : index
    %c0_0 = arith.constant 0 : index
    %0 = vector.load %arg1[%c0, %c0_0] : memref<8x128xbf16, #tpu.memory_space<vmem>>, vector<8x128xbf16>
    %c0_1 = arith.constant 0 : index
    %c0_2 = arith.constant 0 : index
    %1 = vector.load %arg2[%c0_1, %c0_2] : memref<128x128xbf16, #tpu.memory_space<vmem>>, vector<128x128xbf16>
    %c0_3 = arith.constant 0 : index
    %c0_4 = arith.constant 0 : index
    %2 = vector.load %arg3[%c0_3, %c0_4] : memref<1x128xf32, #tpu.memory_space<vmem>>, vector<1x128xf32>
    %cst = arith.constant dense<0.000000e+00> : vector<8x128xf32>
    %3 = tpu.matmul %0, %1, %cst {dimension_numbers = #tpu.dot_dimension_numbers<[1], [0], [0], [1], [0, 0, 1, 1], [], []>} : vector<8x128xbf16>, vector<128x128xbf16>, vector<8x128xf32> -> vector<8x128xf32>
    %4 = vector.broadcast %2 : vector<1x128xf32> to vector<8x128xf32>
    %5 = arith.addf %3, %4 : vector<8x128xf32>
    %cst_5 = arith.constant 0.000000e+00 : f32
    %6 = vector.broadcast %cst_5 : f32 to vector<8x128xf32>
    %7 = arith.maximumf %5, %6 : vector<8x128xf32>
    %8 = arith.truncf %7 : vector<8x128xf32> to vector<8x128xbf16>
    %c0_6 = arith.constant 0 : index
    %c0_7 = arith.constant 0 : index
    %9 = vector.load %arg4[%c0_6, %c0_7] : memref<128x128xbf16, #tpu.memory_space<vmem>>, vector<128x128xbf16>
    %c0_8 = arith.constant 0 : index
    %c0_9 = arith.constant 0 : index
    %10 = vector.load %arg5[%c0_8, %c0_9] : memref<1x128xf32, #tpu.memory_space<vmem>>, vector<1x128xf32>
    %cst_10 = arith.constant dense<0.000000e+00> : vector<8x128xf32>
    %11 = tpu.matmul %8, %9, %cst_10 {dimension_numbers = #tpu.dot_dimension_numbers<[1], [0], [0], [1], [0, 0, 1, 1], [], []>} : vector<8x128xbf16>, vector<128x128xbf16>, vector<8x128xf32> -> vector<8x128xf32>
    %12 = vector.broadcast %10 : vector<1x128xf32> to vector<8x128xf32>
    %13 = arith.addf %11, %12 : vector<8x128xf32>
    %cst_11 = arith.constant 0.000000e+00 : f32
    %14 = vector.broadcast %cst_11 : f32 to vector<8x128xf32>
    %15 = arith.maximumf %13, %14 : vector<8x128xf32>
    %16 = arith.truncf %15 : vector<8x128xf32> to vector<8x128xbf16>
    %c0_12 = arith.constant 0 : index
    %c0_13 = arith.constant 0 : index
    %17 = vector.load %arg6[%c0_12, %c0_13] : memref<128x128xbf16, #tpu.memory_space<vmem>>, vector<128x128xbf16>
    %c0_14 = arith.constant 0 : index
    %c0_15 = arith.constant 0 : index
    %18 = vector.load %arg7[%c0_14, %c0_15] : memref<1x128xf32, #tpu.memory_space<vmem>>, vector<1x128xf32>
    %cst_16 = arith.constant dense<0.000000e+00> : vector<8x128xf32>
    %19 = tpu.matmul %16, %17, %cst_16 {dimension_numbers = #tpu.dot_dimension_numbers<[1], [0], [0], [1], [0, 0, 1, 1], [], []>} : vector<8x128xbf16>, vector<128x128xbf16>, vector<8x128xf32> -> vector<8x128xf32>
    %20 = vector.broadcast %18 : vector<1x128xf32> to vector<8x128xf32>
    %21 = arith.addf %19, %20 : vector<8x128xf32>
    %c0_17 = arith.constant 0 : index
    %c0_18 = arith.constant 0 : index
    %22 = vector.load %arg8[%c0_17, %c0_18] : memref<8x128xf32, #tpu.memory_space<vmem>>, vector<8x128xf32>
    tpu.vector_store %arg8[%c0_17, %c0_18], %21 {strides = array<i32>} : memref<8x128xf32, #tpu.memory_space<vmem>>, vector<8x128xf32>,
    return
  }
  func.func @transform_0(%arg0: i32) -> (i32, i32) {
    %c0_i32 = arith.constant 0 : i32
    %c0_i32_0 = arith.constant 0 : i32
    return %arg0, %c0_i32 : i32, i32
  }
  func.func @transform_1(%arg0: i32) -> (i32, i32) {
    %c0_i32 = arith.constant 0 : i32
    %c0_i32_0 = arith.constant 0 : i32
    %c0_i32_1 = arith.constant 0 : i32
    return %c0_i32, %c0_i32_0 : i32, i32
  }
  func.func @transform_2(%arg0: i32) -> (i32, i32) {
    %c0_i32 = arith.constant 0 : i32
    %c0_i32_0 = arith.constant 0 : i32
    %c0_i32_1 = arith.constant 0 : i32
    return %c0_i32, %c0_i32_0 : i32, i32
  }
  func.func @transform_3(%arg0: i32) -> (i32, i32) {
    %c0_i32 = arith.constant 0 : i32
    %c0_i32_0 = arith.constant 0 : i32
    %c0_i32_1 = arith.constant 0 : i32
    return %c0_i32, %c0_i32_0 : i32, i32
  }
  func.func @transform_4(%arg0: i32) -> (i32, i32) {
    %c0_i32 = arith.constant 0 : i32
    %c0_i32_0 = arith.constant 0 : i32
    %c0_i32_1 = arith.constant 0 : i32
    return %c0_i32, %c0_i32_0 : i32, i32
  }
  func.func @transform_5(%arg0: i32) -> (i32, i32) {
    %c0_i32 = arith.constant 0 : i32
    %c0_i32_0 = arith.constant 0 : i32
    %c0_i32_1 = arith.constant 0 : i32
    return %c0_i32, %c0_i32_0 : i32, i32
  }
  func.func @transform_6(%arg0: i32) -> (i32, i32) {
    %c0_i32 = arith.constant 0 : i32
    %c0_i32_0 = arith.constant 0 : i32
    %c0_i32_1 = arith.constant 0 : i32
    return %c0_i32, %c0_i32_0 : i32, i32
  }
  func.func @transform_7(%arg0: i32) -> (i32, i32) {
    %c0_i32 = arith.constant 0 : i32
    %c0_i32_0 = arith.constant 0 : i32
    return %arg0, %c0_i32 : i32, i32
  }
}

</mosaic_0001>

<bundles_post_ra>
// kernel: tpu_custom_call.1
= control target key start
LH: loop header
LB: loop body
LE: loop exit
PB: predicated region body
PF: predicated region fallthrough
CT: control target
= control target key end

     0   :  { %12 = vsyncpa [#allocation3], 0  ;;  %s685_s0 = inlined_call_operand.hbm [shape: bf16[8,128], index: 0, kind: input, shape index: {}]   ;;  %s686_s1 = inlined_call_operand.hbm [shape: bf16[128,128], index: 1, kind: input, shape index: {}]   ;;  %s687_s2 = inlined_call_operand.vmem [shape: f32[1,128], index: 2, kind: input, shape index: {}]   ;;  %s688_s3 = inlined_call_operand.hbm [shape: bf16[128,128], index: 3, kind: input, shape index: {}]   ;;  %s689_s4 = inlined_call_operand.vmem [shape: f32[1,128], index: 4, kind: input, shape index: {}]   ;;  %s690_s5 = inlined_call_operand.hbm [shape: bf16[128,128], index: 5, kind: input, shape index: {}]   ;;  %s691_s6 = inlined_call_operand.vmem [shape: f32[1,128], index: 6, kind: input, shape index: {}]   ;;  %s692_s7 = inlined_call_operand.hbm [shape: f32[8,128], index: 7, kind: output, shape index: {}]  }
   0x1   :  { %13 = vsyncpa [#allocation6], 0 }
   0x2   :  { %14 = vsyncpa [#allocation9], 0  ;;  %s31_s26 = sshll.u32 %s686_s1, 4  ;;  %s32_s26 = int_to_ptr.hbm [resolvable:$true] %s31_s26 }
   0x3   :  { %15 = vsyncpa [#allocation4], 0  ;;  %s614_s27 = smov [#allocation5]   ;;  %s21_s8 = sshll.u32 %s685_s0, 4  ;;  %s22_s8 = int_to_ptr.hbm [resolvable:$true] %s21_s8 }
   0x4   :  { %s33_s28 = sshll.u32 %s614_s27, 4  ;;  %s615_s9 = smov 64   ;;  %s34_s28 = int_to_ptr.vmem [resolvable:$true] %s33_s28 }
   0x5   :  { %s616_s10 = smov 4   ;;  %s617_s11 = smov [#allocation2]  }
   0x6   :  { %39 = dma.hbm_to_vmem [thread:$0]  %s32_s26, 1024, %s34_s28, [#allocation6], %s615_s9, %s615_s9, %s616_s10  }
   0x7   :  { %s23_s12 = sshll.u32 %s617_s11, 4  ;;  %s46_s15 = sshll.u32 %s688_s3, 4  ;;  %s24_s12 = int_to_ptr.vmem [resolvable:$true] %s23_s12  ;;  %s47_s15 = int_to_ptr.hbm [resolvable:$true] %s46_s15 }
   0x8   :  { %26 = dma.hbm_to_vmem [thread:$0]  %s22_s8, 64, %s24_s12, [#allocation3]  }
   0x9   :  { %s61_s17 = sshll.u32 %s690_s5, 4  ;;  %s618_s18 = smov [#allocation7]   ;;  %s62_s17 = int_to_ptr.hbm [resolvable:$true] %s61_s17 }
   0xa   :  { %s48_s19 = sshll.u32 %s618_s18, 4  ;;  %s619_s0 = smov [#allocation8]   ;;  %s49_s19 = int_to_ptr.vmem [resolvable:$true] %s48_s19 }
   0xb   :  { %54 = dma.hbm_to_vmem [thread:$0]  %s47_s15, 1024, %s49_s19, [#allocation6], %s615_s9, %s615_s9, %s616_s10  }
   0xc   :  { %s63_s20 = sshll.u32 %s619_s0, 4  ;;  %s64_s20 = int_to_ptr.vmem [resolvable:$true] %s63_s20 }
   0xd   :  { %69 = dma.hbm_to_vmem [thread:$0]  %s62_s17, 1024, %s64_s20, [#allocation9], %s615_s9, %s615_s9, %s616_s10  }
   0xe   :  { %606 = dma.done.wait [#allocation3], 64  }
   0xf   :  { %607 = vsyncadd [#allocation3], 4294967232 }
  0x10   :  { %608 = dma.done.wait [#allocation6], 2048  }
  0x11   :  { %609 = vsyncadd [#allocation6], 4294965248 }
  0x12   :  { %610 = dma.done.wait [#allocation9], 1024  }
  0x13   :  { %611 = vsyncadd [#allocation9], 4294966272  ;;  %v459_v0 = vld [vmem:[#allocation5 + $0x38] sm:$0xff]  ;;  %v458_v1 = vld [vmem:[#allocation5 + $0x30] sm:$0xff]  ;;  %s620_s24 = smov [#allocation10]   ;;  %s344_s28 = sshll.u32 %s692_s7, 4  ;;  %s345_s28 = int_to_ptr.hbm [resolvable:$true] %s344_s28 }
  0x14   :  { %157 = vmatpush.bf16.msra.mxu0 %v459_v0  ;;  %v467_v2 = vld [vmem:[#allocation7 + $0x38] sm:$0xff]  ;;  %v466_v3 = vld [vmem:[#allocation7 + $0x30] sm:$0xff]  ;;  %v457_v4 = vld [vmem:[#allocation5 + $0x28] sm:$0xff]  ;;  %s342_s25 = sshll.u32 %s620_s24, 4  ;;  %s343_s25 = int_to_ptr.vmem [resolvable:$true] %s342_s25 }
  0x15   :  { %240 = vmatpush.bf16.msra.mxu1 %v467_v2  ;;  %v465_v5 = vld [vmem:[#allocation7 + $0x28] sm:$0xff]  ;;  %v456_v6 = vld [vmem:[#allocation5 + $0x20] sm:$0xff]  ;;  %v455_v8 = vld [vmem:[#allocation5 + $0x18] sm:$0xff] }
  0x16   :  { %v464_v7 = vld [vmem:[#allocation7 + $0x20] sm:$0xff]  ;;  %v463_v9 = vld [vmem:[#allocation7 + $0x18] sm:$0xff]  ;;  %v454_v10 = vld [vmem:[#allocation5 + $0x10] sm:$0xff] }
  0x17   :  { %v462_v11 = vld [vmem:[#allocation7 + $0x10] sm:$0xff]  ;;  %v453_v12 = vld [vmem:[#allocation5 + $0x8] sm:$0xff]  ;;  %v452_v13 = vld [vmem:[#allocation5] sm:$0xff] }
  0x18   :  { %158 = vmatpush.bf16.msra.mxu0 %v458_v1  ;;  %v88_v14 = vld [vmem:[#allocation2] sm:$0xf]  ;;  %v461_v15 = vld [vmem:[#allocation7 + $0x8] sm:$0xff]  ;;  %v460_v16 = vld [vmem:[#allocation7] sm:$0xff] }
  0x19   :  { %241 = vmatpush.bf16.msra.mxu1 %v466_v3  ;;  %v475_v17 = vld [vmem:[#allocation8 + $0x38] sm:$0xff]  ;;  %v474_v18 = vld [vmem:[#allocation8 + $0x30] sm:$0xff]  ;;  %v473_v19 = vld [vmem:[#allocation8 + $0x28] sm:$0xff] }
  0x1a   :  { %323 = vmatpush.bf16.msra.mxu2 %v475_v17  ;;  %v472_v20 = vld [vmem:[#allocation8 + $0x20] sm:$0xff]  ;;  %v471_v21 = vld [vmem:[#allocation8 + $0x18] sm:$0xff]  ;;  %v470_v22 = vld [vmem:[#allocation8 + $0x10] sm:$0xff] }
  0x1b   :  { %v483_v23 = vld [vmem:[%s687_s2] ss:$0 sm:$0xff]  ;;  %v469_v29 = vld [vmem:[#allocation8 + $0x8] sm:$0xff]  ;;  %v468_v30 = vld [vmem:[#allocation8] sm:$0xff] }
  0x1c   :  { %159 = vmatpush.bf16.msra.mxu0 %v457_v4  ;;  %v484_v31 = vld [vmem:[%s689_s4] ss:$0 sm:$0xff] }
  0x1d   :  { %242 = vmatpush.bf16.msra.mxu1 %v465_v5  ;;  %v485_v37 = vld [vmem:[%s691_s6] ss:$0 sm:$0xff] }
  0x1e   :  { %324 = vmatpush.bf16.msra.mxu2 %v474_v18 }
  0x20   :  { %160 = vmatpush.bf16.msra.mxu0 %v456_v6 }
  0x21   :  { %243 = vmatpush.bf16.msra.mxu1 %v464_v7 }
  0x22   :  { %325 = vmatpush.bf16.msra.mxu2 %v473_v19 }
  0x24   :  { %161 = vmatpush.bf16.msra.mxu0 %v455_v8 }
  0x25   :  { %244 = vmatpush.bf16.msra.mxu1 %v463_v9 }
  0x26   :  { %326 = vmatpush.bf16.msra.mxu2 %v472_v20 }
  0x28   :  { %162 = vmatpush.bf16.msra.mxu0 %v454_v10 }
  0x29   :  { %245 = vmatpush.bf16.msra.mxu1 %v462_v11 }
  0x2a   :  { %327 = vmatpush.bf16.msra.mxu2 %v471_v21 }
  0x2c   :  { %163 = vmatpush.bf16.msra.mxu0 %v453_v12 }
  0x2d   :  { %246 = vmatpush.bf16.msra.mxu1 %v461_v15 }
  0x2e   :  { %328 = vmatpush.bf16.msra.mxu2 %v470_v22 }
  0x30   :  { %164 = vmatpush.bf16.msra.mxu0 %v452_v13 }
  0x31   :  { %247 = vmatpush.bf16.msra.mxu1 %v460_v16 }
  0x32   :  { %329 = vmatpush.bf16.msra.mxu2 %v469_v29 }
  0x33   :  { %165 = vmatmul.bf16.vlgmr.msra.gmra.mxu0 %v88_v14 }
  0x36   :  { %330 = vmatpush.bf16.msra.mxu2 %v468_v30 }
  0xb0   :  { %v166_v24 = vpop.f32.mrf.mxu0 }
  0xb1   :  { %v167_v25 = vadd.f32 %v483_v23, %v166_v24 }
  0xb3   :  { %v170_v26 = vmax.f32 %v167_v25, 0.0 }
  0xb5   :  { %v171_v27 = vpack.c.bf16 %v170_v26, %v170_v26 }
  0xb7   :  { %248 = vmatmul.bf16.vlgmr.msra.gmra.mxu1 %v171_v27 }
  0xb8   :  { %v168_v28 = vpop.f32.mrf.mxu0 }
 0x134   :  { %v249_v32 = vpop.f32.mrf.mxu1 }
 0x135   :  { %v250_v33 = vadd.f32 %v484_v31, %v249_v32 }
 0x137   :  { %v253_v34 = vmax.f32 %v250_v33, 0.0 }
 0x139   :  { %v254_v35 = vpack.c.bf16 %v253_v34, %v253_v34 }
 0x13b   :  { %331 = vmatmul.bf16.vlgmr.msra.gmra.mxu2 %v254_v35 }
 0x13c   :  { %v251_v36 = vpop.f32.mrf.mxu1 }
 0x1be   :  { %v332_v38 = vpop.f32.mrf.mxu2 }
 0x1bf   :  { %v333_v39 = vadd.f32 %v485_v37, %v332_v38 }
 0x1c1   :  { %336 = vst [vmem:[#allocation10] sm:$0xff] %v333_v39 }
 0x1c2   :  { %347 = dma.vmem_to_hbm [thread:$0]  %s343_s25, 128, %s345_s28, [#allocation4]  }
 0x1c6   :  { %v334_v40 = vpop.f32.mrf.mxu2 }
 0x1c7   :  { %612 = dma.done.wait [#allocation4], 128  }
 0x1c8   :  { %613 = vsyncadd [#allocation4], 4294967168 }
 0x1c9   :  { %352 = vsyncpa [#allocation3], 1 }
 0x1ca   :  { %353 = vsyncpa [#allocation6], 1 }
 0x1cb   :  { %354 = vsyncpa [#allocation9], 1 }
 0x1cc   :  { %355 = vsyncpa [#allocation4], 1 }

</bundles_post_ra>
